<compile_context>
chip_gen: v7x
topology: tpu7x:2x2x1
jax: 0.10.0
libtpu: 0.0.40
codegen_flags: <defaults>
</compile_context>

<pallas_src>
import jax
import jax.numpy as jnp
import numpy as np
from jax import lax
from jax.experimental import pallas as pl
from jax.experimental.pallas import tpu as pltpu


# ------------------------------- Pallas wrapper ------------------------------ #
def residual_block_pallas(x_ncl, w1, w2, bn1_params, bn2_params, stride, *,
                          matmul_dtype=jnp.float32, rows_per_step=1024,
                          vmem_budget_bytes=12 * 2**20):
    """x_ncl: (N, Cin, L) float32 (PyTorch NCL).  Returns (N, P, Lout) float32."""
    f32 = jnp.float32
    N, Cin, L = x_ncl.shape
    P = w1.shape[0]
    assert w1.shape == (P, Cin, 3) and w2.shape == (P, P, 3)
    assert stride in (1, 2), "LambdaLayer shortcut (::2) only matches stride 1 or 2"
    if stride == 1 and Cin != P:
        raise ValueError("stride==1 with in_planes != planes is not representable "
                         "(the PyTorch shortcut would shape-mismatch)")
    diff = P - Cin
    assert diff >= 0, "channel-cropping shortcut (planes < in_planes) not supported"
    lo = int(diff * 0.5)

    Lout = (L - 1) // stride + 1              # conv1 output length (k=3, padding=1)

    # ---- glue (XLA): pad length; fold the stride-2 phase into the channel axis ----
    x = x_ncl.astype(f32)
    if stride == 1:
        xk = jnp.pad(x, ((0, 0), (0, 0), (1, 1)))                 # (N, Cin, Lout+2)
        Ck, Lp = Cin, Lout + 2
    else:
        pad_r = 2 * Lout + 1 - L                                  # >= 1
        xk = jnp.pad(x, ((0, 0), (0, 0), (1, pad_r)))             # (N, Cin, 2*Lout+2)
        xk = xk.reshape(N, Cin, Lout + 1, 2)
        # xk2[n, phase*Cin + c, i] = x_pad[n, c, 2*i + phase]
        xk = jnp.transpose(xk, (0, 3, 1, 2)).reshape(N, 2 * Cin, Lout + 1)
        Ck, Lp = 2 * Cin, Lout + 1

    # ---- fold BatchNorm (inference) scale into conv weights, keep biases ----
    def fold(bn):
        gamma, beta, mean, var = bn
        scale = gamma.astype(f32) / jnp.sqrt(var.astype(f32) + 1e-5)
        return scale, beta.astype(f32) - mean.astype(f32) * scale

    s1, b1 = fold(bn1_params)
    s2, b2 = fold(bn2_params)
    # tap-major weights: w1m[k, p, c] = w1[p, c, k] * s1[p]
    w1m = (jnp.transpose(w1.astype(f32), (2, 0, 1)) * s1[None, :, None]).astype(matmul_dtype)
    w2m = (jnp.transpose(w2.astype(f32), (2, 0, 1)) * s2[None, :, None]).astype(matmul_dtype)
    b1r = b1.reshape(P, 1)
    b2r = b2.reshape(P, 1)

    # ---- batch-tile size NB from a per-step VMEM budget + target row count ----
    itemsize = jnp.dtype(matmul_dtype).itemsize
    in_b = Ck * Lp * itemsize                       # input block bytes / item
    out_b = P * Lout * 4                            # output block bytes / item
    work_b = (10 * P * Lout + 6 * P * max(Cin, P)) * 4   # live f32 values (rough)
    per_item = 2 * (in_b + out_b) + work_b          # 2x = double buffering
    NB = max(1, min(N,
                    vmem_budget_bytes // per_item,
                    max(1, rows_per_step // max(Lout, 1))))
    if N >= 2:
        # v7x has 2 TensorCores: keep >= 2 parallel grid steps when batch allows.
        NB = min(NB, (N + 1) // 2)
    NB = int(NB)
    Np = ((N + NB - 1) // NB) * NB

    xk = xk.astype(matmul_dtype)
    if Np != N:
        xk = jnp.pad(xk, ((0, Np - N), (0, 0), (0, 0)))

    DN = (((2,), (1,)), ((0,), (0,)))               # batched matmul, contract channels
    cin_eq_p = (Cin == P)

    # ------------------------------- kernel ---------------------------------- #
    def kernel(x_ref, w1_ref, w2_ref, b1_ref, b2_ref, o_ref):
        # conv1 taps straight from the (stride-folded) input block, in matmul_dtype
        if stride == 1:
            taps = [x_ref[:, :, pl.ds(k, Lout)] for k in range(3)]          # (NB,Cin,Lout)
        else:
            taps = [x_ref[:, pl.ds(0, Cin), pl.ds(0, Lout)],                # x_pad[2l]
                    x_ref[:, pl.ds(Cin, Cin), pl.ds(0, Lout)],              # x_pad[2l+1]
                    x_ref[:, pl.ds(0, Cin), pl.ds(1, Lout)]]                # x_pad[2l+2]

        # conv1 (+ folded BN1 scale): 3 accumulating batched MXU dots
        w1a = w1_ref[...]
        h1 = None
        for k in range(3):
            wk = jnp.broadcast_to(w1a[k], (NB, P, Cin))
            d = lax.dot_general(wk, taps[k], DN, preferred_element_type=f32)
            h1 = d if h1 is None else h1 + d
        h1 = jnp.maximum(h1 + b1_ref[...], 0.0)                             # (NB,P,Lout) f32

        # conv2 taps: XLU lane rolls + one iota edge-mask each (no scratch buffer)
        lane = lax.broadcasted_iota(jnp.int32, (NB, P, Lout), 2)
        t_prev = jnp.where(lane == 0, 0.0, pltpu.roll(h1, 1, axis=2))        # h1[l-1]
        t_next = jnp.where(lane == Lout - 1, 0.0,
                           pltpu.roll(h1, Lout - 1, axis=2))                 # h1[l+1]
        c2_taps = (t_prev, h1, t_next)

        # conv2 (+ folded BN2 scale): 3 accumulating batched MXU dots
        w2a = w2_ref[...]
        h2 = None
        for k in range(3):
            wk = jnp.broadcast_to(w2a[k], (NB, P, P))
            d = lax.dot_general(wk, c2_taps[k].astype(matmul_dtype), DN,
                                preferred_element_type=f32)
            h2 = d if h2 is None else h2 + d
        h2 = h2 + b2_ref[...]                                               # (NB,P,Lout) f32

        # shortcut = centre conv1 tap (== x for stride 1, == x[:, :, ::2] for
        # stride 2), zero-padded on the channel axis; then final ReLU.
        sc = taps[1].astype(f32)                                            # (NB,Cin,Lout)
        if cin_eq_p:
            o_ref[...] = jnp.maximum(h2 + sc, 0.0)
        else:
            o_ref[...] = jnp.maximum(h2, 0.0)                               # sc == 0 outside band
            o_ref[:, pl.ds(lo, Cin), :] = jnp.maximum(h2[:, lo:lo + Cin, :] + sc, 0.0)

    out = pl.pallas_call(
        kernel,
        out_shape=jax.ShapeDtypeStruct((Np, P, Lout), f32),
        grid=(Np // NB,),
        in_specs=[
            pl.BlockSpec((NB, Ck, Lp), lambda i: (i, 0, 0)),    # stride-folded input
            pl.BlockSpec((3, P, Cin), lambda i: (0, 0, 0)),     # conv1 weight (BN folded)
            pl.BlockSpec((3, P, P), lambda i: (0, 0, 0)),       # conv2 weight (BN folded)
            pl.BlockSpec((P, 1), lambda i: (0, 0)),             # BN1 bias
            pl.BlockSpec((P, 1), lambda i: (0, 0)),             # BN2 bias
        ],
        out_specs=pl.BlockSpec((NB, P, Lout), lambda i: (i, 0, 0)),
        compiler_params=pltpu.CompilerParams(
            dimension_semantics=("parallel",),
            vmem_limit_bytes=32 * 2**20),
    )(xk, w1m, w2m, b1r, b2r)

    return out[:N]                                               # (N, P, Lout) — already NCL


# ----------------------------- pure-JAX reference ---------------------------- #
def residual_block_ref(x_ncl, w1, w2, bn1_params, bn2_params, stride):
    def conv1d(x, w, s):
        return lax.conv_general_dilated(
            x, w, window_strides=(s,), padding=[(1, 1)],
            dimension_numbers=("NCH", "OIH", "NCH"))

    def bn(x, params):
        gamma, beta, mean, var = params
        scale = gamma / jnp.sqrt(var + 1e-5)
        return x * scale[None, :, None] + (beta - mean * scale)[None, :, None]

    Cin = x_ncl.shape[1]
    P = w1.shape[0]
    out = jax.nn.relu(bn(conv1d(x_ncl, w1, stride), bn1_params))
    out = bn(conv1d(out, w2, 1), bn2_params)
    if stride != 1 or Cin != P:
        diff = P - Cin
        sc = jnp.pad(x_ncl[:, :, ::2],
                     ((0, 0), (int(diff * 0.5), int((diff + 1) * 0.5)), (0, 0)))
    else:
        sc = x_ncl
    return jax.nn.relu(out + sc)


# ------------------------------------ main ----------------------------------- #
if __name__ == "__main__":
    key = jax.random.PRNGKey(0)
    ks = jax.random.split(key, 12)

    # --- block 1: in_planes=4 -> planes=8, stride=2 (projection shortcut) ---
    N, Cin, L, P, stride = 2, 4, 16, 8, 2
    x = jax.random.normal(ks[0], (N, Cin, L), jnp.float32)
    w1 = jax.random.normal(ks[1], (P, Cin, 3), jnp.float32) * 0.2
    w2 = jax.random.normal(ks[2], (P, P, 3), jnp.float32) * 0.2
    bn1 = (1.0 + 0.1 * jax.random.normal(ks[3], (P,), jnp.float32),
           0.1 * jax.random.normal(ks[4], (P,), jnp.float32),
           0.1 * jax.random.normal(ks[5], (P,), jnp.float32),
           1.0 + 0.1 * jax.random.uniform(ks[6], (P,), jnp.float32))
    bn2 = (1.0 + 0.05 * jax.random.normal(ks[7], (P,), jnp.float32),
           jnp.zeros((P,), jnp.float32), jnp.zeros((P,), jnp.float32),
           jnp.ones((P,), jnp.float32))

    out = jax.block_until_ready(residual_block_pallas(x, w1, w2, bn1, bn2, stride))
    ref = residual_block_ref(x, w1, w2, bn1, bn2, stride)
    np.testing.assert_allclose(np.asarray(out), np.asarray(ref), rtol=1e-4, atol=1e-4)

    # bf16 matmul-input path (helps HBM bandwidth on all generations, incl. v5e);
    # f32 accumulation/epilogue.  Shortcut is added from the bf16-quantized input,
    # hence the looser tolerance.
    out_bf16 = jax.block_until_ready(
        residual_block_pallas(x, w1, w2, bn1, bn2, stride, matmul_dtype=jnp.bfloat16))
    np.testing.assert_allclose(np.asarray(out_bf16), np.asarray(ref), rtol=1e-1, atol=1e-1)

    # --- block 2: identity shortcut (stride=1, in_planes == planes) ---
    N2, C2, L2 = 2, 8, 16
    x2 = jax.random.normal(ks[8], (N2, C2, L2), jnp.float32)
    w1b = jax.random.normal(ks[9], (C2, C2, 3), jnp.float32) * 0.2
    w2b = jax.random.normal(ks[10], (C2, C2, 3), jnp.float32) * 0.2
    bnI = (jnp.ones((C2,), jnp.float32), jnp.zeros((C2,), jnp.float32),
           jnp.zeros((C2,), jnp.float32), jnp.ones((C2,), jnp.float32))
    out2 = jax.block_until_ready(residual_block_pallas(x2, w1b, w2b, bnI, bnI, 1))
    ref2 = residual_block_ref(x2, w1b, w2b, bnI, bnI, 1)
    np.testing.assert_allclose(np.asarray(out2), np.asarray(ref2), rtol=1e-4, atol=1e-4)

    print("KERNEL_OK")
</pallas_src>

<mosaic_0001>
module attributes {stable_mosaic.version = 11 : i64} {
  func.func @kernel(%arg0: i32, %arg1: memref<1x8x9xf32, #tpu.memory_space<vmem>>, %arg2: memref<3x8x4xf32, #tpu.memory_space<vmem>>, %arg3: memref<3x8x8xf32, #tpu.memory_space<vmem>>, %arg4: memref<8x1xf32, #tpu.memory_space<vmem>>, %arg5: memref<8x1xf32, #tpu.memory_space<vmem>>, %arg6: memref<1x8x8xf32, #tpu.memory_space<vmem>>) attributes {dimension_semantics = [#tpu.dimension_semantics<parallel>], iteration_bounds = array<i64: 2>, scalar_prefetch = 0 : i64, scratch_operands = 0 : i64, tpu.core_type = #tpu.core_type<tc>, window_params = [{transform_indices = @transform_0, window_bounds = array<i64: 1, 8, 9>}, {pipeline_mode = #tpu.pipeline_mode<synchronous>, transform_indices = @transform_1, window_bounds = array<i64: 3, 8, 4>}, {pipeline_mode = #tpu.pipeline_mode<synchronous>, transform_indices = @transform_2, window_bounds = array<i64: 3, 8, 8>}, {pipeline_mode = #tpu.pipeline_mode<synchronous>, transform_indices = @transform_3, window_bounds = array<i64: 8, 1>}, {pipeline_mode = #tpu.pipeline_mode<synchronous>, transform_indices = @transform_4, window_bounds = array<i64: 8, 1>}, {transform_indices = @transform_5, window_bounds = array<i64: 1, 8, 8>}]} {
    %c0 = arith.constant 0 : index
    %c0_0 = arith.constant 0 : index
    %c0_1 = arith.constant 0 : index
    %0 = vector.load %arg1[%c0, %c0_0, %c0_1] : memref<1x8x9xf32, #tpu.memory_space<vmem>>, vector<1x4x8xf32>
    %c0_2 = arith.constant 0 : index
    %c4 = arith.constant 4 : index
    %c0_3 = arith.constant 0 : index
    %1 = vector.load %arg1[%c0_2, %c4, %c0_3] : memref<1x8x9xf32, #tpu.memory_space<vmem>>, vector<1x4x8xf32>
    %c0_4 = arith.constant 0 : index
    %c0_5 = arith.constant 0 : index
    %c1 = arith.constant 1 : index
    %2 = vector.load %arg1[%c0_4, %c0_5, %c1] : memref<1x8x9xf32, #tpu.memory_space<vmem>>, vector<1x4x8xf32>
    %c0_6 = arith.constant 0 : index
    %c0_7 = arith.constant 0 : index
    %c0_8 = arith.constant 0 : index
    %3 = vector.load %arg2[%c0_6, %c0_7, %c0_8] : memref<3x8x4xf32, #tpu.memory_space<vmem>>, vector<3x8x4xf32>
    %4 = vector.extract_strided_slice %3 {offsets = [0, 0, 0], sizes = [1, 8, 4], strides = [1, 1, 1]} : vector<3x8x4xf32> to vector<1x8x4xf32>
    %5 = vector.shape_cast %4 : vector<1x8x4xf32> to vector<8x4xf32>
    %6 = vector.shape_cast %5 : vector<8x4xf32> to vector<1x8x4xf32>
    %cst = arith.constant dense<0.000000e+00> : vector<1x8x8xf32>
    %7 = tpu.matmul %6, %0, %cst {dimension_numbers = #tpu.dot_dimension_numbers<[2], [1], [1], [2], [0, 0, 0, 1, 1, 2], [0], [0]>} : vector<1x8x4xf32>, vector<1x4x8xf32>, vector<1x8x8xf32> -> vector<1x8x8xf32>
    %8 = vector.extract_strided_slice %3 {offsets = [1, 0, 0], sizes = [1, 8, 4], strides = [1, 1, 1]} : vector<3x8x4xf32> to vector<1x8x4xf32>
    %9 = vector.shape_cast %8 : vector<1x8x4xf32> to vector<8x4xf32>
    %10 = vector.shape_cast %9 : vector<8x4xf32> to vector<1x8x4xf32>
    %cst_9 = arith.constant dense<0.000000e+00> : vector<1x8x8xf32>
    %11 = tpu.matmul %10, %1, %cst_9 {dimension_numbers = #tpu.dot_dimension_numbers<[2], [1], [1], [2], [0, 0, 0, 1, 1, 2], [0], [0]>} : vector<1x8x4xf32>, vector<1x4x8xf32>, vector<1x8x8xf32> -> vector<1x8x8xf32>
    %12 = arith.addf %7, %11 : vector<1x8x8xf32>
    %13 = vector.extract_strided_slice %3 {offsets = [2, 0, 0], sizes = [1, 8, 4], strides = [1, 1, 1]} : vector<3x8x4xf32> to vector<1x8x4xf32>
    %14 = vector.shape_cast %13 : vector<1x8x4xf32> to vector<8x4xf32>
    %15 = vector.shape_cast %14 : vector<8x4xf32> to vector<1x8x4xf32>
    %cst_10 = arith.constant dense<0.000000e+00> : vector<1x8x8xf32>
    %16 = tpu.matmul %15, %2, %cst_10 {dimension_numbers = #tpu.dot_dimension_numbers<[2], [1], [1], [2], [0, 0, 0, 1, 1, 2], [0], [0]>} : vector<1x8x4xf32>, vector<1x4x8xf32>, vector<1x8x8xf32> -> vector<1x8x8xf32>
    %17 = arith.addf %12, %16 : vector<1x8x8xf32>
    %c0_11 = arith.constant 0 : index
    %c0_12 = arith.constant 0 : index
    %18 = vector.load %arg4[%c0_11, %c0_12] : memref<8x1xf32, #tpu.memory_space<vmem>>, vector<8x1xf32>
    %19 = vector.shape_cast %18 : vector<8x1xf32> to vector<1x8x1xf32>
    %20 = vector.broadcast %19 : vector<1x8x1xf32> to vector<1x8x8xf32>
    %21 = arith.addf %17, %20 : vector<1x8x8xf32>
    %cst_13 = arith.constant 0.000000e+00 : f32
    %22 = vector.broadcast %cst_13 : f32 to vector<1x8x8xf32>
    %23 = arith.maximumf %21, %22 : vector<1x8x8xf32>
    %24 = tpu.iota {dimensions = array<i32: 2>} : vector<1x8x8xi32>
    %c0_i32 = arith.constant 0 : i32
    %25 = vector.broadcast %c0_i32 : i32 to vector<1x8x8xi32>
    %26 = arith.cmpi eq, %24, %25 : vector<1x8x8xi32>
    %c1_i32 = arith.constant 1 : i32
    %27 = tpu.dynamic_rotate %23 by %c1_i32 dim 2 : vector<1x8x8xf32>, i32 -> vector<1x8x8xf32>
    %cst_14 = arith.constant 0.000000e+00 : f32
    %28 = vector.broadcast %cst_14 : f32 to vector<1x8x8xf32>
    %29 = arith.select %26, %28, %27 : vector<1x8x8xi1>, vector<1x8x8xf32>
    %c7_i32 = arith.constant 7 : i32
    %30 = vector.broadcast %c7_i32 : i32 to vector<1x8x8xi32>
    %31 = arith.cmpi eq, %24, %30 : vector<1x8x8xi32>
    %c7_i32_15 = arith.constant 7 : i32
    %32 = tpu.dynamic_rotate %23 by %c7_i32_15 dim 2 : vector<1x8x8xf32>, i32 -> vector<1x8x8xf32>
    %cst_16 = arith.constant 0.000000e+00 : f32
    %33 = vector.broadcast %cst_16 : f32 to vector<1x8x8xf32>
    %34 = arith.select %31, %33, %32 : vector<1x8x8xi1>, vector<1x8x8xf32>
    %c0_17 = arith.constant 0 : index
    %c0_18 = arith.constant 0 : index
    %c0_19 = arith.constant 0 : index
    %35 = vector.load %arg3[%c0_17, %c0_18, %c0_19] : memref<3x8x8xf32, #tpu.memory_space<vmem>>, vector<3x8x8xf32>
    %36 = vector.extract_strided_slice %35 {offsets = [0, 0, 0], sizes = [1, 8, 8], strides = [1, 1, 1]} : vector<3x8x8xf32> to vector<1x8x8xf32>
    %37 = vector.shape_cast %36 : vector<1x8x8xf32> to vector<8x8xf32>
    %38 = vector.shape_cast %37 : vector<8x8xf32> to vector<1x8x8xf32>
    %cst_20 = arith.constant dense<0.000000e+00> : vector<1x8x8xf32>
    %39 = tpu.matmul %38, %29, %cst_20 {dimension_numbers = #tpu.dot_dimension_numbers<[2], [1], [1], [2], [0, 0, 0, 1, 1, 2], [0], [0]>} : vector<1x8x8xf32>, vector<1x8x8xf32>, vector<1x8x8xf32> -> vector<1x8x8xf32>
    %40 = vector.extract_strided_slice %35 {offsets = [1, 0, 0], sizes = [1, 8, 8], strides = [1, 1, 1]} : vector<3x8x8xf32> to vector<1x8x8xf32>
    %41 = vector.shape_cast %40 : vector<1x8x8xf32> to vector<8x8xf32>
    %42 = vector.shape_cast %41 : vector<8x8xf32> to vector<1x8x8xf32>
    %cst_21 = arith.constant dense<0.000000e+00> : vector<1x8x8xf32>
    %43 = tpu.matmul %42, %23, %cst_21 {dimension_numbers = #tpu.dot_dimension_numbers<[2], [1], [1], [2], [0, 0, 0, 1, 1, 2], [0], [0]>} : vector<1x8x8xf32>, vector<1x8x8xf32>, vector<1x8x8xf32> -> vector<1x8x8xf32>
    %44 = arith.addf %39, %43 : vector<1x8x8xf32>
    %45 = vector.extract_strided_slice %35 {offsets = [2, 0, 0], sizes = [1, 8, 8], strides = [1, 1, 1]} : vector<3x8x8xf32> to vector<1x8x8xf32>
    %46 = vector.shape_cast %45 : vector<1x8x8xf32> to vector<8x8xf32>
    %47 = vector.shape_cast %46 : vector<8x8xf32> to vector<1x8x8xf32>
    %cst_22 = arith.constant dense<0.000000e+00> : vector<1x8x8xf32>
    %48 = tpu.matmul %47, %34, %cst_22 {dimension_numbers = #tpu.dot_dimension_numbers<[2], [1], [1], [2], [0, 0, 0, 1, 1, 2], [0], [0]>} : vector<1x8x8xf32>, vector<1x8x8xf32>, vector<1x8x8xf32> -> vector<1x8x8xf32>
    %49 = arith.addf %44, %48 : vector<1x8x8xf32>
    %c0_23 = arith.constant 0 : index
    %c0_24 = arith.constant 0 : index
    %50 = vector.load %arg5[%c0_23, %c0_24] : memref<8x1xf32, #tpu.memory_space<vmem>>, vector<8x1xf32>
    %51 = vector.shape_cast %50 : vector<8x1xf32> to vector<1x8x1xf32>
    %52 = vector.broadcast %51 : vector<1x8x1xf32> to vector<1x8x8xf32>
    %53 = arith.addf %49, %52 : vector<1x8x8xf32>
    %cst_25 = arith.constant 0.000000e+00 : f32
    %54 = vector.broadcast %cst_25 : f32 to vector<1x8x8xf32>
    %55 = arith.maximumf %53, %54 : vector<1x8x8xf32>
    %c0_26 = arith.constant 0 : index
    %c0_27 = arith.constant 0 : index
    %c0_28 = arith.constant 0 : index
    %56 = vector.load %arg6[%c0_26, %c0_27, %c0_28] : memref<1x8x8xf32, #tpu.memory_space<vmem>>, vector<1x8x8xf32>
    tpu.vector_store %arg6[%c0_26, %c0_27, %c0_28], %55 {strides = array<i32>} : memref<1x8x8xf32, #tpu.memory_space<vmem>>, vector<1x8x8xf32>,
    %57 = vector.extract_strided_slice %53 {offsets = [0, 2, 0], sizes = [1, 4, 8], strides = [1, 1, 1]} : vector<1x8x8xf32> to vector<1x4x8xf32>
    %58 = arith.addf %57, %1 : vector<1x4x8xf32>
    %cst_29 = arith.constant 0.000000e+00 : f32
    %59 = vector.broadcast %cst_29 : f32 to vector<1x4x8xf32>
    %60 = arith.maximumf %58, %59 : vector<1x4x8xf32>
    %c0_30 = arith.constant 0 : index
    %c2 = arith.constant 2 : index
    %c0_31 = arith.constant 0 : index
    %61 = vector.load %arg6[%c0_30, %c2, %c0_31] : memref<1x8x8xf32, #tpu.memory_space<vmem>>, vector<1x4x8xf32>
    tpu.vector_store %arg6[%c0_30, %c2, %c0_31], %60 {strides = array<i32>} : memref<1x8x8xf32, #tpu.memory_space<vmem>>, vector<1x4x8xf32>,
    return
  }
  func.func @transform_0(%arg0: i32) -> (i32, i32, i32) {
    %c0_i32 = arith.constant 0 : i32
    %c0_i32_0 = arith.constant 0 : i32
    %c0_i32_1 = arith.constant 0 : i32
    return %arg0, %c0_i32, %c0_i32_0 : i32, i32, i32
  }
  func.func @transform_1(%arg0: i32) -> (i32, i32, i32) {
    %c0_i32 = arith.constant 0 : i32
    %c0_i32_0 = arith.constant 0 : i32
    %c0_i32_1 = arith.constant 0 : i32
    %c0_i32_2 = arith.constant 0 : i32
    return %c0_i32, %c0_i32_0, %c0_i32_1 : i32, i32, i32
  }
  func.func @transform_2(%arg0: i32) -> (i32, i32, i32) {
    %c0_i32 = arith.constant 0 : i32
    %c0_i32_0 = arith.constant 0 : i32
    %c0_i32_1 = arith.constant 0 : i32
    %c0_i32_2 = arith.constant 0 : i32
    return %c0_i32, %c0_i32_0, %c0_i32_1 : i32, i32, i32
  }
  func.func @transform_3(%arg0: i32) -> (i32, i32) {
    %c0_i32 = arith.constant 0 : i32
    %c0_i32_0 = arith.constant 0 : i32
    %c0_i32_1 = arith.constant 0 : i32
    return %c0_i32, %c0_i32_0 : i32, i32
  }
  func.func @transform_4(%arg0: i32) -> (i32, i32) {
    %c0_i32 = arith.constant 0 : i32
    %c0_i32_0 = arith.constant 0 : i32
    %c0_i32_1 = arith.constant 0 : i32
    return %c0_i32, %c0_i32_0 : i32, i32
  }
  func.func @transform_5(%arg0: i32) -> (i32, i32, i32) {
    %c0_i32 = arith.constant 0 : i32
    %c0_i32_0 = arith.constant 0 : i32
    %c0_i32_1 = arith.constant 0 : i32
    return %arg0, %c0_i32, %c0_i32_0 : i32, i32, i32
  }
}

</mosaic_0001>

<bundles_post_ra>
// kernel: tpu_custom_call.1
= control target key start
LH: loop header
LB: loop body
LE: loop exit
PB: predicated region body
PF: predicated region fallthrough
CT: control target
= control target key end

     0   :  { %10 = vsyncpa [#allocation3], 0  ;;  %s1158_s0 = inlined_call_operand.vmem [shape: f32[2,8,9], index: 0, kind: input, shape index: {}]   ;;  %s1159_s1 = inlined_call_operand.vmem [shape: f32[3,8,4], index: 1, kind: input, shape index: {}]   ;;  %s1160_s2 = inlined_call_operand.vmem [shape: f32[3,8,8], index: 2, kind: input, shape index: {}]   ;;  %s1161_s3 = inlined_call_operand.vmem [shape: f32[8,1], index: 3, kind: input, shape index: {}]   ;;  %s1162_s4 = inlined_call_operand.vmem [shape: f32[8,1], index: 4, kind: input, shape index: {}]   ;;  %s1163_s5 = inlined_call_operand.hbm [shape: f32[2,8,8], index: 5, kind: output, shape index: {}]  }
   0x1   :  { %12 = vsyncpa [#allocation3 + $0x1], 0  ;;  %s1012_s18 = smov 0   ;;  %s1014_s19 = smov 0  }
   0x2   :  { %s1016_s20 = smov 0   ;;  %s1018_s21 = smov 0  }
   0x3 LB: > { %s1033_s22 = sadd.s32 4294967295, %s973_s21   ;;  %s797_s23 = sadd.s32 4294967294, %s973_s21   ;;  %s973_s21 = sphi %s1018_s21, %s1169_s21   ;;  %s969_s20 = sphi %s1016_s20, %s1168_s20   ;;  %s965_s19 = sphi %s1014_s19, %s1167_s19   ;;  %s961_s18 = sphi %s1012_s18, %s1166_s18  }
   0x4   : > { %s1037_s24 = sadd.s32 1, %s973_s21   ;;  %s135_s25 = sadd.s32 1, %s969_s20 }
   0x5   : > { %s132_s26 = ssub.s32 %s973_s21, %s1037_s24  ;;  %p145_p0 = scmp.ne.s32.totalorder %s969_s20, %s965_s19 }
   0x6   : > { %p133_p1 = scmp.eq.s32.totalorder %s132_s26, 0  ;;  %p146_p2 = scmp.eq.s32.totalorder %s1033_s22, 1 }
   0x7   : > { %p151_p3 = scmp.ne.s32.totalorder %s965_s19, %s961_s18  ;;  %p152_p4 = scmp.eq.s32.totalorder %s797_s23, 1 }
   0x8   : > { %s1048_s27 = scalar_select %p133_p1, %s969_s20, %s135_s25  }
   0x9   : > { %p1050_p5 = por %p146_p2, %p145_p0  ;;  %p1054_p6 = por %p152_p4, %p151_p3 }
   0xa   : > { %p800_p7 = scmp.ge.s32.totalorder %s973_s21, 1  ;;  %p189_p8 = scmp.lt.s32.totalorder %s973_s21, 3 }
   0xc   : > { %p190_p9 = pnand %p800_p7, %p189_p8 }
   0xd   : > { %p216_p10 = scmp.lt.s32.totalorder (!%p190_p9), %s1033_s22, 1  ;;  %v975_v0 = vmov (!%p190_p9), 0.0   ;;  %vm976_vm0 = vmmov (!%p190_p9), 0   ;;  %v977_v1 = vmov (!%p190_p9), 0   ;;  %vm229_vm1 = vcmask (!%p190_p9), 1043456   ;;  %v223_v2 = vld [vmem:[%s1159_s1 + $0x8] sm:$0xff] (!%p190_p9) }
   0xe   : > { %193 = sbr.rel (%p190_p9) target bundleno = 944 (0x3b0), region = 40  ;;  %834 = vmatprep.subr.mxu0 (!%p190_p9), %v975_v0  ;;  %836 = vmatprep.mubr.msk.f32.mxu0 (!%p190_p9), %vm976_vm0, %v975_v0  ;;  %vm225_vm2 = vcmask (!%p190_p9), 31744   ;;  %v222_v5 = vld [vmem:[%s1159_s1] sm:$0xff] (!%p190_p9)  ;;  %s978_s14 = smov (!%p190_p9), 127   ;;  %v224_v7 = vld [vmem:[%s1159_s1 + $0x10] sm:$0xff] (!%p190_p9)  ;;  %vm468_vm3 = vcmask (!%p190_p9), 1047616   ;;  %v465_v26 = vlaneseq (!%p190_p9) }
   0xf   : > { %839 = vmatprep.subr.mxu1 (!%p190_p9), %v975_v0  ;;  %841 = vmatprep.mubr.msk.f32.mxu1 (!%p190_p9), %vm976_vm0, %v975_v0  ;;  %v457_v6 = vld [vmem:[%s1161_s3] sm:$0xff] (!%p190_p9)  ;;  %s979_s25 = smov (!%p190_p9), 8   ;;  %v486_v22 = vld [vmem:[%s1160_s2 + $0x8] sm:$0xff] (!%p190_p9)  ;;  %vm488_vm4 = vcmask (!%p190_p9), 64512   ;;  %v487_v29 = vld [vmem:[%s1160_s2 + $0x10] sm:$0xff] (!%p190_p9)  ;;  %s213_s13 = sand.u32 (!%p190_p9), 1, %s965_s19  }
  0x10   : > { %909 = vset.pattern.permute.xlu0 (!%p190_p9), %v977_v1  ;;  %910 = vset.pattern.permute.xlu1 (!%p190_p9), %v977_v1  ;;  %v709_v25 = vld [vmem:[%s1162_s4] sm:$0xff] (!%p190_p9)  ;;  %v466_v27 = vand.u32 (!%p190_p9), 127, %v465_v26  ;;  %s817_s15 = sshll.u32 (!%p190_p9), %s1033_s22, 7  ;;  %vm722_vm7 = vcmask (!%p190_p9), 62466  }
  0x11   : > { %v485_v28 = vld [vmem:[%s1160_s2] sm:$0xff] (!%p190_p9)  ;;  %s1116_s26 = scalar_lea.hbm (!%p190_p9), %s1163_s5, %s817_s15 }
  0x12   : > { %vm820_vm5 = vcmp.ne.s32.totalorder (!%p190_p9), %v466_v27, 0  ;;  %vm821_vm6 = vcmp.ne.s32.totalorder (!%p190_p9), %v466_v27, 7 }
  0x15   : > { %s217_s30 = scalar_select %p216_p10, %s1033_s22, 1 }
  0x16   : > { %s725_s22 = scalar_lea.sflag [#allocation3], %s213_s13 }
  0x17   : > { %s802_s6 = sshll.u32 %s217_s30, 3 }
  0x18   : > { %s219_s9 = scalar_lea.vmem %s1158_s0, %s802_s6  ;;  %s980_s6 = smov 121  }
  0x19   : > { %v220_v3 = vld [vmem:[%s219_s9] sm:$0xf]  ;;  %v1070_v4 = vld [vmem:[%s219_s9 + $0x4] sm:$0xf] }
  0x1a   : > { %379 = vrot.lane.b32.xlu0 %v220_v3, %s978_s14  ;;  %835 = vmatpush3.msk.msra.mxu0 %vm229_vm1, %v1070_v4  ;;  %v718_v40 = vrot.slane %v1070_v4, 6 }
  0x1b   : > { %837 = vmatmul.mubr.msk.f32.vlgmr.msra.gmra.mrb[0].mxu0 %vm225_vm2, %v223_v2  ;;  %840 = vmatpush3.msk.msra.mxu1 %vm229_vm1, %v220_v3 }
  0x1c   : > { %842 = vmatmul.mubr.msk.f32.vlgmr.msra.gmra.mrb[0].mxu1 %vm225_vm2, %v222_v5  ;;  %844 = vmatprep.subr.mxu0 %v975_v0 }
  0x1d   : > { %846 = vmatprep.mubr.msk.f32.mxu0 %vm976_vm0, %v975_v0  ;;  %849 = vmatprep.subr.mxu1 %v975_v0 }
  0x1e   : > { %460 = vperm.xlu0 %909, %v457_v6   ;;  %851 = vmatprep.mubr.msk.f32.mxu1 %vm976_vm0, %v975_v0 }
  0x8c   : > { %v380_v8 = vpop.permute.xlu0 %379 }
  0x8d   : > { %845 = vmatpush3.msk.msra.mxu0 %vm229_vm1, %v380_v8 }
  0x8e   : > { %847 = vmatmul.mubr.msk.f32.vlgmr.msra.gmra.mrb[2].mxu0 %vm225_vm2, %v224_v7  ;;  %854 = vmatprep.subr.mxu0 %v975_v0 }
  0x8f   : > { %856 = vmatprep.mubr.msk.f32.mxu0 %vm976_vm0, %v975_v0 }
  0x9d   : > { %v461_v15 = vpop.permute.xlu0 %460 }
  0xee   : > { %v299_v9 = vpop.f32.mrb[0].mxu0 }
  0xef   : > { %v838_v10 = vpop.f32.mrb[1].mxu0  ;;  %v375_v11 = vpop.f32.mrb[0].mxu1 }
  0xf0   : > { %v376_v12 = vadd.f32 %v375_v11, %v299_v9  ;;  %v843_v13 = vpop.f32.mrb[1].mxu1 }
 0x161   : > { %v452_v14 = vpop.f32.mrb[2].mxu0 }
 0x162   : > { %v456_v16 = vadd.f32 %v452_v14, %v376_v12  ;;  %v848_v17 = vpop.f32.mrb[3].mxu0 }
 0x164   : > { %v463_v18 = vadd.f32 %v461_v15, %v456_v16 }
 0x166   : > { %v464_v19 = vmax.f32 %v463_v18, 0.0 }
 0x168   : > { %469 = vrot.lane.b32.xlu1 %v464_v19, %s979_s25  ;;  %850 = vmatpush3.msra.mxu1 %v464_v19 }
 0x169   : > { %859 = vmatprep.subr.mxu1 %v975_v0  ;;  %852 = vmatmul.mubr.msk.f32.vlgmr.msra.gmra.mrb[2].mxu1 %vm488_vm4, %v486_v22 }
 0x16a   : > { %861 = vmatprep.mubr.msk.f32.mxu1 %vm976_vm0, %v975_v0 }
 0x1da   : > { %v470_v20 = vpop.permute.xlu1 %469 }
 0x1db   : > { %v471_v21 = vsel %vm468_vm3, %v470_v20, %v464_v19 }
 0x1dc   : > { %472 = vrot.lane.b32.xlu1 %v471_v21, %s979_s25 }
 0x23c   : > { %v558_v32 = vpop.f32.mrb[2].mxu1 }
 0x23d   : > { %v853_v33 = vpop.f32.mrb[3].mxu1 }
 0x24e   : > { %v473_v23 = vpop.permute.xlu1 %472 }
 0x24f   : > { %v474_v24 = vsel %vm468_vm3, %v473_v23, %v464_v19 }
 0x250   : > { %481 = vrot.lane.b32.xlu0 %v474_v24, %s978_s14  ;;  %476 = vrot.lane.b32.xlu1 %v474_v24, %s980_s6  ;;  %s801_s14 = sshll.u32 %s213_s13, 3  ;;  %s981_s6 = smov [#allocation2]  }
 0x251   : > { %s215_s16 = scalar_lea.vmem [#allocation2], %s801_s14  ;;  %s915_s7 = sshll.u32 %s981_s6, 4  ;;  %s916_s7 = int_to_ptr.vmem [resolvable:$false] %s915_s7 }
 0x252   : > { %s738_s17 = sshll.u32 %s215_s16, 4  ;;  %s917_s8 = scalar_lea.vmem %s916_s7, 256  ;;  %s1118_s17 = int_to_ptr.vmem [resolvable:$true] %s738_s17 }
 0x253   : > { %s911_s30 = scalar_lea.vmem %s1118_s17, 128  ;;  %p918_p0 = scmp.lt.s32.totalorder %s1118_s17, %s916_s7 }
 0x254   : > { %712 = vperm.xlu1 %910, %v709_v25   ;;  %p912_p11 = scmp.ne.s32.totalorder %s1118_s17, %s911_s30  ;;  %p919_p1 = scmp.lt.s32.totalorder %s917_s8, %s911_s30 }
 0x256   : > { %p913_p12 = pnand %p912_p11, %p1050_p5  ;;  %p920_p2 = por %p919_p1, %p918_p0 }
 0x258   : > { %p914_p13 = pneg %p913_p12 }
 0x25a   : > { %p921_p3 = pnand %p920_p2, %p914_p13 }
 0x2c2   : > { %v482_v30 = vpop.permute.xlu0 %481  ;;  %v477_v31 = vpop.permute.xlu1 %476 }
 0x2c3   : > { %855 = vmatpush3.msk.msra.mxu0 %vm820_vm5, %v477_v31  ;;  %860 = vmatpush3.msk.msra.mxu1 %vm821_vm6, %v482_v30 }
 0x2c4   : > { %857 = vmatmul.mubr.msk.f32.vlgmr.msra.gmra.mrb[4].mxu0 %vm488_vm4, %v485_v28  ;;  %862 = vmatmul.mubr.msk.f32.vlgmr.msra.gmra.mrb[4].mxu1 %vm488_vm4, %v487_v29 }
 0x2d3   : > { %v713_v39 = vpop.permute.xlu1 %712 }
 0x397   : > { %v631_v34 = vpop.f32.mrb[4].mxu0  ;;  %v704_v35 = vpop.f32.mrb[4].mxu1 }
 0x398   : > { %v632_v36 = vadd.f32 %v631_v34, %v558_v32  ;;  %v858_v37 = vpop.f32.mrb[5].mxu0  ;;  %v863_v38 = vpop.f32.mrb[5].mxu1 }
 0x39a   : > { %v708_v41 = vadd.f32 %v704_v35, %v632_v36 }
 0x39c   : > { %v715_v42 = vadd.f32 %v713_v39, %v708_v41 }
 0x39e   : > { %v716_v43 = vmax.f32 %v715_v42, 0.0  ;;  %v720_v44 = vadd.f32 %v718_v40, %v715_v42 }
 0x3a0   : > { %v721_v45 = vmax.f32 %v720_v44, 0.0  ;;  %717 = vst.msk [vmem:[%s215_s16] sm:$0xff] %vm488_vm4, %v716_v43 }
 0x3a2   : > { %723 = vst.msk [vmem:[%s215_s16] sm:$0x3c] %vm722_vm7, %v721_v45 }
 0x3a3   : > { %924 = shalt.err (!%p921_p3)
}
 0x3a4   : > { %s925_s9 = scalar_lea.hbm %s1116_s26, 128  ;;  %s929_s12 = scalar_lea.hbm %s1163_s5, 256 }
 0x3a5   : > { %p926_p4 = scmp.ne.s32.totalorder %s1116_s26, %s925_s9  ;;  %p930_p9 = scmp.lt.u32.totalorder %s1116_s26, %s1163_s5 }
 0x3a6   : > { %p931_p10 = scmp.lt.u32.totalorder %s929_s12, %s925_s9  ;;  %p933_p12 = scmp.lt.u32.totalorder %s925_s9, %s1116_s26 }
 0x3a7   : > { %p927_p7 = pnand %p926_p4, %p1050_p5 }
 0x3a8   : > { %p932_p11 = por %p931_p10, %p930_p9 }
 0x3a9   : > { %p928_p8 = pneg %p927_p7 }
 0x3aa   : > { %p934_p13 = por %p933_p12, %p932_p11 }
 0x3ac   : > { %p935_p0 = pnand %p934_p13, %p928_p8 }
 0x3ae   : > { %938 = shalt.err (!%p935_p0)
}
 0x3af   : > { %864 = dma.vmem_to_hbm [thread:$0]  (%p1050_p5), %s1118_s17, 128, %s1116_s26, %s725_s22  }
 0x3b0 PF: > { %p870_p1 = scmp.ge.s32.totalorder %s973_s21, 2  ;;  %s750_s15 = sand.u32 1, %s961_s18  }
 0x3b1   : > { %s751_s16 = scalar_lea.sflag [#allocation3], %s750_s15 }
 0x3b2   : > { %p867_p2 = pnand %p870_p1, %p1054_p6 }
 0x3b4   : > { %956 = dma.done.wait (!%p867_p2), %s751_s16, 128  }
 0x3b5   : > { %958 = vsyncadd (!%p867_p2), %s751_s16, 4294967168  ;;  %p15_p3 = scmp.ge.s32.totalorder %s1037_s24, 4   ;;  %s1166_s18 = smov %s965_s19 }
 0x3b6   : > { %s1167_s19 = smov %s969_s20  ;;  %s1168_s20 = smov %s1048_s27 }
 0x3b7   : > { %s1169_s21 = smov %s1037_s24  ;;  %17 = sbr.rel (!%p15_p3) target bundleno = 3 (0x3), region = 75 }
 0x3be   :  { %756 = vsyncpa [#allocation3], 1 }
 0x3bf   :  { %758 = vsyncpa [#allocation3 + $0x1], 1 }

</bundles_post_ra>
